<compile_context>
chip_gen: v5e
topology: v5e:2x2
jax: 0.10.0
libtpu: 0.0.40
codegen_flags: <defaults>
</compile_context>

<pallas_src>
import math

import jax
import jax.numpy as jnp
import numpy as np
from jax.experimental import pallas as pl
from jax.experimental.pallas import tpu as pltpu

_LANE = 128


def _round_up(n, m):
    return ((n + m - 1) // m) * m


# --------------------------------------------------------------------------- #
# Weight packing: fuse branch a (full x) and branch b (x[:, :3]) into one MLP, #
# stored TRANSPOSED for the batch-on-lanes kernel layout.                      #
# --------------------------------------------------------------------------- #
def _pack_params(weights_a, biases_a, weights_b, biases_b, out_pad, compute_dtype):
    """Build block-diagonal fused weights, returned transposed (cols, rows).

    Layer 0 : W = [ wa0 | wb0 (rows 0..rb-1, rest zero) ]        -> (in_a, ha+hb)
    Middle  : W = block_diag(wa_i, wb_i)                         -> (ha+hb, ...)
    Last    : branch a -> cols [0, out_a), branch b -> cols
              [out_pad, out_pad+out_b) of a 2*out_pad slab; padded cols have
              zero weights and zero bias, so they stay exactly 0.
    Returned as W^T (cols, rows) in compute_dtype and bias (cols, 1) in f32.
    """
    n = len(weights_a)
    # TODO(synk): fusion assumes equal branch depths (true for this PINN model).
    assert len(weights_b) == n, "branch fusion requires equal layer counts"
    # Layer-0 fusion assumes branch b consumes a PREFIX of x's features.
    assert weights_b[0].shape[0] <= weights_a[0].shape[0], (
        "branch b must read a prefix of x's features")
    wts, bs = [], []
    for i in range(n):
        wa, wb = weights_a[i], weights_b[i]
        ba, bb = biases_a[i], biases_b[i]
        ra, ca = wa.shape
        rb, cb = wb.shape
        is_first = i == 0
        is_last = i == n - 1
        rows = ra if is_first else ra + rb        # first layer: both branches read x
        cols = 2 * out_pad if is_last else ca + cb
        r0 = 0 if is_first else ra                # row offset of branch-b block
        c0 = out_pad if is_last else ca           # col offset of branch-b block
        w = jnp.zeros((rows, cols), jnp.float32)
        w = w.at[:ra, :ca].set(wa)
        w = w.at[r0:r0 + rb, c0:c0 + cb].set(wb)
        b = jnp.zeros((cols,), jnp.float32)
        b = b.at[:ca].set(ba)
        b = b.at[c0:c0 + cb].set(bb)
        wts.append(w.T.astype(compute_dtype))     # (cols, rows) MXU operand
        bs.append(b.reshape(-1, 1))               # (cols, 1) f32 bias column
    return wts, bs


# --------------------------------------------------------------------------- #
# Kernel (transposed: features on sublanes, batch on lanes)                    #
# --------------------------------------------------------------------------- #
def _make_fused_kernel(n_layers, out_pad):
    def kernel(x_ref, *refs):
        # refs layout: [w1t, b1, w2t, b2, ..., wnt, bn, out_ref]
        out_ref = refs[-1]
        h = x_ref[...]                            # (F_in, TB) compute dtype
        for i in range(n_layers):
            wt = refs[2 * i][...]                 # (cols, rows)
            b = refs[2 * i + 1][...]              # (cols, 1) f32
            h = jnp.dot(wt, h.astype(wt.dtype),   # bf16 x bf16 -> f32 acc (MXU)
                        preferred_element_type=jnp.float32) + b
            if i < n_layers - 1:
                h = jnp.maximum(h, 0.0)           # ReLU in f32 (VPU, v5e-safe)
        # h: (2*out_pad, TB) f32; a-half * b-half is a sublane split (no XLU).
        out_ref[...] = (h[:out_pad, :] * h[out_pad:, :]).astype(out_ref.dtype)

    return kernel


# --------------------------------------------------------------------------- #
# Wrapper                                                                      #
# --------------------------------------------------------------------------- #
def neural_network_forward(x, weights_a, biases_a, weights_b, biases_b,
                           *, compute_dtype=jnp.bfloat16,
                           out_dtype=jnp.bfloat16, max_batch_tile=8192):
    n = len(weights_a)
    batch, in_dim = x.shape
    out_a = weights_a[-1].shape[1]
    out_b = weights_b[-1].shape[1]
    assert out_a == out_b, "branch outputs must match for the elementwise product"
    out_dim = out_a
    out_pad = max(8, _round_up(out_dim, 8))       # sublane slab for each branch

    wts, bs = _pack_params(weights_a, biases_a, weights_b, biases_b,
                           out_pad, compute_dtype)

    # Batch tiling: batch rides the lane dim, so tiles are multiples of 128.
    # When the batch allows it, force >= 2 grid steps so the "parallel" axis
    # actually shards across v7x's two TensorCores.
    max_batch_tile = max(_LANE, _round_up(max_batch_tile, _LANE))
    padded_b = _round_up(batch, _LANE)
    if padded_b >= 2 * _LANE:
        padded_b = _round_up(padded_b, 2 * _LANE)
        tb = min(max_batch_tile, padded_b // 2)
    else:
        tb = padded_b
    padded_b = _round_up(padded_b, tb)
    grid = (padded_b // tb,)

    xt = x.T.astype(compute_dtype)                # (in_dim, batch) — cheap XLA op
    if padded_b != batch:
        xt = jnp.pad(xt, ((0, 0), (0, padded_b - batch)))

    in_specs = [pl.BlockSpec((in_dim, tb), lambda i: (0, i))]
    operands = [xt]
    for w, b in zip(wts, bs):
        in_specs.append(pl.BlockSpec(w.shape, lambda i: (0, 0)))   # resident weight
        in_specs.append(pl.BlockSpec(b.shape, lambda i: (0, 0)))   # resident bias
        operands.extend([w, b])

    out = pl.pallas_call(
        _make_fused_kernel(n, out_pad),
        out_shape=jax.ShapeDtypeStruct((out_pad, padded_b), out_dtype),
        grid=grid,
        in_specs=in_specs,
        out_specs=pl.BlockSpec((out_pad, tb), lambda i: (0, i)),
        compiler_params=pltpu.CompilerParams(
            dimension_semantics=("parallel",)),   # shard batch tiles across TCs
    )(*operands)
    # (out_pad, padded_b) -> (batch, out_dim): cheap slice + transpose in XLA.
    return out[:out_dim, :batch].T


# --------------------------------------------------------------------------- #
# Init (matches the PyTorch module) + references                               #
# --------------------------------------------------------------------------- #
def _xavier_normal(key, fan_in, fan_out):
    std = math.sqrt(2.0 / (fan_in + fan_out))
    return jax.random.normal(key, (fan_in, fan_out), dtype=jnp.float32) * std


def init_params(key, layer_sizes):
    """xavier_normal weights (stored as (in, out)), zero biases."""
    ws, bs = [], []
    for i in range(len(layer_sizes) - 1):
        key, sub = jax.random.split(key)
        ws.append(_xavier_normal(sub, layer_sizes[i], layer_sizes[i + 1]))
        bs.append(jnp.zeros((layer_sizes[i + 1],), dtype=jnp.float32))
    return key, ws, bs


def reference_forward_f32(x, wa, ba, wb, bb):
    """Original two-branch semantics, full f32."""
    a = x
    for i in range(len(wa)):
        a = a @ wa[i] + ba[i]
        if i < len(wa) - 1:
            a = jnp.maximum(a, 0.0)
    b = x[:, :3]
    for i in range(len(wb)):
        b = b @ wb[i] + bb[i]
        if i < len(wb) - 1:
            b = jnp.maximum(b, 0.0)
    return a * b


def reference_forward_bf16(x, wa, ba, wb, bb):
    """Numerics-matched reference: bf16 matmul operands, f32 accumulation."""
    def branch(h, ws, bs):
        for i in range(len(ws)):
            h = jnp.dot(h.astype(jnp.bfloat16), ws[i].astype(jnp.bfloat16),
                        preferred_element_type=jnp.float32) + bs[i]
            if i < len(ws) - 1:
                h = jnp.maximum(h, 0.0)
        return h
    return branch(x, wa, ba) * branch(x[:, :3], wb, bb)


if __name__ == "__main__":
    # layers = [[in_a, hidden, hidden, out], [3, hidden, hidden, out]]
    layers = [[4, 32, 32, 3], [3, 32, 32, 3]]

    key = jax.random.PRNGKey(0)
    key, wa, ba = init_params(key, layers[0])
    key, wb, bb = init_params(key, layers[1])

    for batch in (8, 1000):          # single-tile case and multi-tile (grid=2) case
        key, xk = jax.random.split(key)
        x = jax.random.normal(xk, (batch, layers[0][0]), dtype=jnp.float32)

        out = jax.block_until_ready(
            neural_network_forward(x, wa, ba, wb, bb))
        out_f32 = np.asarray(out).astype(np.float32)

        # Check against a reference with matching bf16-operand / f32-acc numerics
        # (kernel output is bf16, so allow bf16 rounding of the final product).
        ref_bf16 = np.asarray(jax.block_until_ready(
            reference_forward_bf16(x, wa, ba, wb, bb)))
        np.testing.assert_allclose(out_f32, ref_bf16, rtol=1e-2, atol=1e-3)

        # Loose sanity check against the full-f32 two-branch reference.
        ref_f32 = np.asarray(jax.block_until_ready(
            reference_forward_f32(x, wa, ba, wb, bb)))
        np.testing.assert_allclose(out_f32, ref_f32, rtol=1e-1, atol=2e-2)

    # TODO(synk): loss_pde uses torch.autograd.grad (PINN residuals); gradients
    # are out of scope for this forward-pass kernel.
    print("KERNEL_OK")
</pallas_src>

<mosaic_0001>
module attributes {stable_mosaic.version = 11 : i64} {
  func.func @kernel(%arg0: i32, %arg1: memref<4x128xbf16, #tpu.memory_space<vmem>>, %arg2: memref<64x4xbf16, #tpu.memory_space<vmem>>, %arg3: memref<64x1xf32, #tpu.memory_space<vmem>>, %arg4: memref<64x64xbf16, #tpu.memory_space<vmem>>, %arg5: memref<64x1xf32, #tpu.memory_space<vmem>>, %arg6: memref<16x64xbf16, #tpu.memory_space<vmem>>, %arg7: memref<16x1xf32, #tpu.memory_space<vmem>>, %arg8: memref<8x128xbf16, #tpu.memory_space<vmem>>) attributes {dimension_semantics = [#tpu.dimension_semantics<parallel>], iteration_bounds = array<i64: 1>, scalar_prefetch = 0 : i64, scratch_operands = 0 : i64, tpu.core_type = #tpu.core_type<tc>, window_params = [{transform_indices = @transform_0, window_bounds = array<i64: 4, 128>}, {pipeline_mode = #tpu.pipeline_mode<synchronous>, transform_indices = @transform_1, window_bounds = array<i64: 64, 4>}, {pipeline_mode = #tpu.pipeline_mode<synchronous>, transform_indices = @transform_2, window_bounds = array<i64: 64, 1>}, {pipeline_mode = #tpu.pipeline_mode<synchronous>, transform_indices = @transform_3, window_bounds = array<i64: 64, 64>}, {pipeline_mode = #tpu.pipeline_mode<synchronous>, transform_indices = @transform_4, window_bounds = array<i64: 64, 1>}, {pipeline_mode = #tpu.pipeline_mode<synchronous>, transform_indices = @transform_5, window_bounds = array<i64: 16, 64>}, {pipeline_mode = #tpu.pipeline_mode<synchronous>, transform_indices = @transform_6, window_bounds = array<i64: 16, 1>}, {transform_indices = @transform_7, window_bounds = array<i64: 8, 128>}]} {
    %c0 = arith.constant 0 : index
    %c0_0 = arith.constant 0 : index
    %0 = vector.load %arg1[%c0, %c0_0] : memref<4x128xbf16, #tpu.memory_space<vmem>>, vector<4x128xbf16>
    %c0_1 = arith.constant 0 : index
    %c0_2 = arith.constant 0 : index
    %1 = vector.load %arg2[%c0_1, %c0_2] : memref<64x4xbf16, #tpu.memory_space<vmem>>, vector<64x4xbf16>
    %c0_3 = arith.constant 0 : index
    %c0_4 = arith.constant 0 : index
    %2 = vector.load %arg3[%c0_3, %c0_4] : memref<64x1xf32, #tpu.memory_space<vmem>>, vector<64x1xf32>
    %cst = arith.constant dense<0.000000e+00> : vector<64x128xf32>
    %3 = tpu.matmul %1, %0, %cst {dimension_numbers = #tpu.dot_dimension_numbers<[1], [0], [0], [1], [0, 0, 1, 1], [], []>} : vector<64x4xbf16>, vector<4x128xbf16>, vector<64x128xf32> -> vector<64x128xf32>
    %4 = vector.broadcast %2 : vector<64x1xf32> to vector<64x128xf32>
    %5 = arith.addf %3, %4 : vector<64x128xf32>
    %cst_5 = arith.constant 0.000000e+00 : f32
    %6 = vector.broadcast %cst_5 : f32 to vector<64x128xf32>
    %7 = arith.maximumf %5, %6 : vector<64x128xf32>
    %c0_6 = arith.constant 0 : index
    %c0_7 = arith.constant 0 : index
    %8 = vector.load %arg4[%c0_6, %c0_7] : memref<64x64xbf16, #tpu.memory_space<vmem>>, vector<64x64xbf16>
    %c0_8 = arith.constant 0 : index
    %c0_9 = arith.constant 0 : index
    %9 = vector.load %arg5[%c0_8, %c0_9] : memref<64x1xf32, #tpu.memory_space<vmem>>, vector<64x1xf32>
    %10 = arith.truncf %7 : vector<64x128xf32> to vector<64x128xbf16>
    %cst_10 = arith.constant dense<0.000000e+00> : vector<64x128xf32>
    %11 = tpu.matmul %8, %10, %cst_10 {dimension_numbers = #tpu.dot_dimension_numbers<[1], [0], [0], [1], [0, 0, 1, 1], [], []>} : vector<64x64xbf16>, vector<64x128xbf16>, vector<64x128xf32> -> vector<64x128xf32>
    %12 = vector.broadcast %9 : vector<64x1xf32> to vector<64x128xf32>
    %13 = arith.addf %11, %12 : vector<64x128xf32>
    %cst_11 = arith.constant 0.000000e+00 : f32
    %14 = vector.broadcast %cst_11 : f32 to vector<64x128xf32>
    %15 = arith.maximumf %13, %14 : vector<64x128xf32>
    %c0_12 = arith.constant 0 : index
    %c0_13 = arith.constant 0 : index
    %16 = vector.load %arg6[%c0_12, %c0_13] : memref<16x64xbf16, #tpu.memory_space<vmem>>, vector<16x64xbf16>
    %c0_14 = arith.constant 0 : index
    %c0_15 = arith.constant 0 : index
    %17 = vector.load %arg7[%c0_14, %c0_15] : memref<16x1xf32, #tpu.memory_space<vmem>>, vector<16x1xf32>
    %18 = arith.truncf %15 : vector<64x128xf32> to vector<64x128xbf16>
    %cst_16 = arith.constant dense<0.000000e+00> : vector<16x128xf32>
    %19 = tpu.matmul %16, %18, %cst_16 {dimension_numbers = #tpu.dot_dimension_numbers<[1], [0], [0], [1], [0, 0, 1, 1], [], []>} : vector<16x64xbf16>, vector<64x128xbf16>, vector<16x128xf32> -> vector<16x128xf32>
    %20 = vector.broadcast %17 : vector<16x1xf32> to vector<16x128xf32>
    %21 = arith.addf %19, %20 : vector<16x128xf32>
    %22 = vector.extract_strided_slice %21 {offsets = [0, 0], sizes = [8, 128], strides = [1, 1]} : vector<16x128xf32> to vector<8x128xf32>
    %23 = vector.extract_strided_slice %21 {offsets = [8, 0], sizes = [8, 128], strides = [1, 1]} : vector<16x128xf32> to vector<8x128xf32>
    %24 = arith.mulf %22, %23 : vector<8x128xf32>
    %25 = arith.truncf %24 : vector<8x128xf32> to vector<8x128xbf16>
    %c0_17 = arith.constant 0 : index
    %c0_18 = arith.constant 0 : index
    %26 = vector.load %arg8[%c0_17, %c0_18] : memref<8x128xbf16, #tpu.memory_space<vmem>>, vector<8x128xbf16>
    tpu.vector_store %arg8[%c0_17, %c0_18], %25 {strides = array<i32>} : memref<8x128xbf16, #tpu.memory_space<vmem>>, vector<8x128xbf16>,
    return
  }
  func.func @transform_0(%arg0: i32) -> (i32, i32) {
    %c0_i32 = arith.constant 0 : i32
    %c0_i32_0 = arith.constant 0 : i32
    return %c0_i32, %arg0 : i32, i32
  }
  func.func @transform_1(%arg0: i32) -> (i32, i32) {
    %c0_i32 = arith.constant 0 : i32
    %c0_i32_0 = arith.constant 0 : i32
    %c0_i32_1 = arith.constant 0 : i32
    return %c0_i32, %c0_i32_0 : i32, i32
  }
  func.func @transform_2(%arg0: i32) -> (i32, i32) {
    %c0_i32 = arith.constant 0 : i32
    %c0_i32_0 = arith.constant 0 : i32
    %c0_i32_1 = arith.constant 0 : i32
    return %c0_i32, %c0_i32_0 : i32, i32
  }
  func.func @transform_3(%arg0: i32) -> (i32, i32) {
    %c0_i32 = arith.constant 0 : i32
    %c0_i32_0 = arith.constant 0 : i32
    %c0_i32_1 = arith.constant 0 : i32
    return %c0_i32, %c0_i32_0 : i32, i32
  }
  func.func @transform_4(%arg0: i32) -> (i32, i32) {
    %c0_i32 = arith.constant 0 : i32
    %c0_i32_0 = arith.constant 0 : i32
    %c0_i32_1 = arith.constant 0 : i32
    return %c0_i32, %c0_i32_0 : i32, i32
  }
  func.func @transform_5(%arg0: i32) -> (i32, i32) {
    %c0_i32 = arith.constant 0 : i32
    %c0_i32_0 = arith.constant 0 : i32
    %c0_i32_1 = arith.constant 0 : i32
    return %c0_i32, %c0_i32_0 : i32, i32
  }
  func.func @transform_6(%arg0: i32) -> (i32, i32) {
    %c0_i32 = arith.constant 0 : i32
    %c0_i32_0 = arith.constant 0 : i32
    %c0_i32_1 = arith.constant 0 : i32
    return %c0_i32, %c0_i32_0 : i32, i32
  }
  func.func @transform_7(%arg0: i32) -> (i32, i32) {
    %c0_i32 = arith.constant 0 : i32
    %c0_i32_0 = arith.constant 0 : i32
    return %c0_i32, %arg0 : i32, i32
  }
}

</mosaic_0001>

<bundles_post_ra>
// kernel: tpu_custom_call.1
= control target key start
LH: loop header
LB: loop body
LE: loop exit
PB: predicated region body
PF: predicated region fallthrough
CT: control target
= control target key end

     0   :  { %vm118_vm0 = vcmask 1041408   ;;  %v442_v2 = vmov 0   ;;  %vm105_vm1 = vcmask 31744   ;;  %s580_s0 = inlined_call_operand.vmem [shape: bf16[4,128], index: 0, kind: input, shape index: {}]   ;;  %s581_s1 = inlined_call_operand.vmem [shape: bf16[64,4], index: 1, kind: input, shape index: {}]   ;;  %s582_s2 = inlined_call_operand.vmem [shape: f32[64,1], index: 2, kind: input, shape index: {}]   ;;  %s583_s3 = inlined_call_operand.vmem [shape: bf16[64,64], index: 3, kind: input, shape index: {}]   ;;  %s584_s4 = inlined_call_operand.vmem [shape: f32[64,1], index: 4, kind: input, shape index: {}]   ;;  %s585_s5 = inlined_call_operand.vmem [shape: bf16[16,64], index: 5, kind: input, shape index: {}]   ;;  %s586_s6 = inlined_call_operand.vmem [shape: f32[16,1], index: 6, kind: input, shape index: {}]   ;;  %s587_s7 = inlined_call_operand.hbm [shape: bf16[8,128], index: 7, kind: output, shape index: {}]  }
   0x1   :  { %v43_v0 = vld [vmem:[%s582_s2 + $0x30] sm:$0xff]  ;;  %v28_v1 = vld [vmem:[%s580_s0] sm:$0x3]  ;;  %413 = vset.pattern.permute.xlu0 %v442_v2  ;;  %414 = vset.pattern.permute.xlu1 %v442_v2  ;;  %v396_v6 = vld [vmem:[%s581_s1 + $0x18] sm:$0xff] }
   0x2   :  { %v120_v3 = vsel %vm118_vm0, %v28_v1, 0  ;;  %v393_v4 = vld [vmem:[%s581_s1] sm:$0xff]  ;;  %77 = vperm.xlu0 %413, %v43_v0   ;;  %415 = vset.pattern.permute.xlu2 %v442_v2  ;;  %v39_v7 = vld [vmem:[%s582_s2 + $0x10] sm:$0xff] }
   0x3   :  { %v41_v5 = vld [vmem:[%s582_s2 + $0x20] sm:$0xff]  ;;  %129 = vmatpush.bf16.msra.mxu0 %v120_v3  ;;  %402 = vmatpush.bf16.msra.mxu1 %v120_v3 }
   0x4   :  { %67 = vperm.xlu1 %414, %v41_v5   ;;  %57 = vperm.xlu2 %415, %v39_v7  }
   0x6   :  { %364 = vmatmul.msk.bf16.vlgmr.msra.gmra.mxu0 %vm105_vm1, %v393_v4  ;;  %367 = vmatmul.msk.bf16.vlgmr.msra.gmra.mxu1 %vm105_vm1, %v396_v6 }
   0x7   :  { %12 = vsyncpa [#allocation3], 0  ;;  %v44_v8 = vld [vmem:[%s582_s2 + $0x38] sm:$0xff]  ;;  %v42_v9 = vld [vmem:[%s582_s2 + $0x28] sm:$0xff]  ;;  %vm239_vm2 = vcmask 523264   ;;  %s443_s27 = smov [#allocation2]  }
   0x8   :  { %v40_v10 = vld [vmem:[%s582_s2 + $0x18] sm:$0xff]  ;;  %v37_v11 = vld [vmem:[%s582_s2] sm:$0xff]  ;;  %v38_v12 = vld [vmem:[%s582_s2 + $0x8] sm:$0xff]  ;;  %s337_s28 = sshll.u32 %s443_s27, 4  ;;  %s339_s30 = sshll.u32 %s587_s7, 4  ;;  %s338_s28 = int_to_ptr.vmem [resolvable:$true] %s337_s28  ;;  %s340_s30 = int_to_ptr.hbm [resolvable:$true] %s339_s30 }
   0x9   :  { %v394_v13 = vld [vmem:[%s581_s1 + $0x8] sm:$0xff]  ;;  %v173_v14 = vld [vmem:[%s584_s4 + $0x30] sm:$0xff]  ;;  %v174_v15 = vld [vmem:[%s584_s4 + $0x38] sm:$0xff] }
   0xa   :  { %82 = vperm.xlu0 %413, %v44_v8   ;;  %v171_v16 = vld [vmem:[%s584_s4 + $0x20] sm:$0xff]  ;;  %v172_v17 = vld [vmem:[%s584_s4 + $0x28] sm:$0xff]  ;;  %v169_v18 = vld [vmem:[%s584_s4 + $0x10] sm:$0xff] }
   0xb   :  { %v170_v19 = vld [vmem:[%s584_s4 + $0x18] sm:$0xff]  ;;  %v395_v20 = vld [vmem:[%s581_s1 + $0x10] sm:$0xff]  ;;  %v167_v21 = vld [vmem:[%s584_s4] sm:$0xff] }
   0xc   :  { %72 = vperm.xlu1 %414, %v42_v9   ;;  %62 = vperm.xlu2 %415, %v40_v10   ;;  %v168_v22 = vld [vmem:[%s584_s4 + $0x8] sm:$0xff]  ;;  %v291_v23 = vld [vmem:[%s586_s6] sm:$0xff]  ;;  %v399_v63 = vld [vmem:[%s583_s3 + $0x10] sm:$0xff] }
   0xd   :  { %v292_v24 = vld [vmem:[%s586_s6 + $0x8] sm:$0xff]  ;;  %v397_v61 = vld [vmem:[%s583_s3] sm:$0xff]  ;;  %v400_v0 = vld [vmem:[%s583_s3 + $0x18] sm:$0xff] }
   0xe   :  { %v398_v62 = vld [vmem:[%s583_s3 + $0x8] sm:$0xff] }
  0x12   :  { %47 = vperm.xlu0 %413, %v37_v11  }
  0x14   :  { %52 = vperm.xlu1 %414, %v38_v12   ;;  %211 = vperm.xlu2 %415, %v173_v14  }
  0x16   :  { %365 = vmatmul.msk.bf16.gmra.mxu0 %vm105_vm1, %v394_v13 }
  0x1a   :  { %216 = vperm.xlu0 %413, %v174_v15  }
  0x1c   :  { %201 = vperm.xlu1 %414, %v171_v16   ;;  %206 = vperm.xlu2 %415, %v172_v17  }
  0x22   :  { %191 = vperm.xlu0 %413, %v169_v18  }
  0x24   :  { %196 = vperm.xlu1 %414, %v170_v19   ;;  %181 = vperm.xlu2 %415, %v167_v21  }
  0x26   :  { %366 = vmatmul.msk.bf16.gmra.mxu0 %vm105_vm1, %v395_v20 }
  0x2a   :  { %186 = vperm.xlu0 %413, %v168_v22  }
  0x2c   :  { %299 = vperm.xlu1 %414, %v291_v23   ;;  %304 = vperm.xlu2 %415, %v292_v24  }
  0x5e   :  { %v58_v39 = vpop.permute.xlu2 %57 }
  0x66   :  { %v63_v43 = vpop.permute.xlu2 %62 }
  0x6e   :  { %v212_v4 = vpop.permute.xlu2 %211 }
  0x74   :  { %v78_v25 = vpop.permute.xlu0 %77 }
  0x76   :  { %v68_v37 = vpop.permute.xlu1 %67  ;;  %v207_v11 = vpop.permute.xlu2 %206 }
  0x7c   :  { %v83_v30 = vpop.permute.xlu0 %82 }
  0x7e   :  { %v73_v40 = vpop.permute.xlu1 %72 }
  0x83   :  { %v131_v26 = vpop.f32.mrf.mxu0  ;;  %v146_v27 = vpop.f32.mrf.mxu1 }
  0x84   :  { %v147_v28 = vadd.f32 %v146_v27, %v78_v25  ;;  %v48_v51 = vpop.permute.xlu0 %47 }
  0x85   :  { %v132_v55 = vadd.f32 %v131_v26, %v48_v51 }
  0x86   :  { %v157_v32 = vmax.f32 %v147_v28, 0.0  ;;  %v53_v47 = vpop.permute.xlu1 %52 }
  0x87   :  { %v151_v59 = vmax.f32 %v132_v55, 0.0 }
  0x8b   :  { %v133_v29 = vpop.f32.mrf.mxu0  ;;  %v148_v31 = vpop.f32.mrf.mxu1 }
  0x8c   :  { %v149_v33 = vadd.f32 %v148_v31, %v83_v30  ;;  %v134_v52 = vadd.f32 %v133_v29, %v53_v47  ;;  %v217_v3 = vpop.permute.xlu0 %216  ;;  %v182_v30 = vpop.permute.xlu2 %181 }
  0x8e   :  { %v158_v34 = vmax.f32 %v149_v33, 0.0  ;;  %v152_v57 = vmax.f32 %v134_v52, 0.0  ;;  %v202_v7 = vpop.permute.xlu1 %201 }
  0x90   :  { %v178_v35 = vpack.c.bf16 %v158_v34, %v157_v32  ;;  %v175_v60 = vpack.c.bf16 %v152_v57, %v151_v59 }
  0x92   :  { %256 = vmatpush.bf16.msrb.mxu1 %v178_v35  ;;  %403 = vmatpush.bf16.msra.mxu2 %v178_v35 }
  0x93   :  { %v136_v36 = vpop.f32.mrf.mxu0  ;;  %404 = vmatpush.bf16.msra.mxu3 %v178_v35 }
  0x94   :  { %v137_v48 = vadd.f32 %v136_v36, %v58_v39  ;;  %v192_v9 = vpop.permute.xlu0 %191  ;;  %v305_v39 = vpop.permute.xlu2 %304 }
  0x96   :  { %v153_v56 = vmax.f32 %v137_v48, 0.0  ;;  %v197_v19 = vpop.permute.xlu1 %196 }
  0x9b   :  { %v138_v38 = vpop.f32.mrf.mxu0 }
  0x9c   :  { %v139_v45 = vadd.f32 %v138_v38, %v63_v43  ;;  %v187_v26 = vpop.permute.xlu0 %186 }
  0x9e   :  { %v154_v53 = vmax.f32 %v139_v45, 0.0 }
  0xa0   :  { %v176_v58 = vpack.c.bf16 %v154_v53, %v153_v56 }
  0xa3   :  { %v141_v41 = vpop.f32.mrf.mxu0 }
  0xa4   :  { %v142_v42 = vadd.f32 %v141_v41, %v68_v37  ;;  %v401_v37 = vld [vmem:[%s585_s5] sm:$0xff] }
  0xa6   :  { %v155_v49 = vmax.f32 %v142_v42, 0.0 }
  0xab   :  { %v143_v44 = vpop.f32.mrf.mxu0 }
  0xac   :  { %v144_v46 = vadd.f32 %v143_v44, %v73_v40  ;;  %v300_v40 = vpop.permute.xlu1 %299 }
  0xae   :  { %v156_v50 = vmax.f32 %v144_v46, 0.0 }
  0xb0   :  { %v177_v54 = vpack.c.bf16 %v156_v50, %v155_v49 }
  0xb2   :  { %257 = vmatpush.bf16.msrb.mxu1 %v177_v54  ;;  %405 = vmatpush.bf16.msra.mxu2 %v177_v54 }
  0xb3   :  { %406 = vmatpush.bf16.msra.mxu3 %v177_v54 }
  0xb6   :  { %258 = vmatpush.bf16.msrb.mxu1 %v176_v58  ;;  %407 = vmatpush.bf16.msra.mxu2 %v176_v58 }
  0xb7   :  { %408 = vmatpush.bf16.msra.mxu3 %v176_v58 }
  0xba   :  { %259 = vmatpush.bf16.msrb.mxu1 %v175_v60  ;;  %409 = vmatpush.bf16.msra.mxu2 %v175_v60 }
  0xbb   :  { %410 = vmatpush.bf16.msra.mxu3 %v175_v60 }
  0xbd   :  { %384 = vmatmul.msk.bf16.vlgmr.msrb.gmra.mxu1 %vm239_vm2, %v397_v61  ;;  %385 = vmatmul.msk.bf16.vlgmr.msra.gmra.mxu2 %vm239_vm2, %v398_v62 }
  0xbe   :  { %386 = vmatmul.msk.bf16.vlgmr.msra.gmra.mxu3 %vm239_vm2, %v399_v63 }
  0xce   :  { %387 = vmatmul.msk.bf16.gmra.mxu3 %vm239_vm2, %v400_v0 }
 0x13a   :  { %v261_v8 = vpop.f32.mrf.mxu1 }
 0x13b   :  { %v262_v31 = vadd.f32 %v261_v8, %v182_v30 }
 0x13d   :  { %v281_v35 = vmax.f32 %v262_v31, 0.0 }
 0x140   :  { %v266_v5 = vpop.f32.mrf.mxu2 }
 0x141   :  { %v271_v1 = vpop.f32.mrf.mxu3  ;;  %v267_v24 = vadd.f32 %v266_v5, %v192_v9 }
 0x142   :  { %v272_v16 = vadd.f32 %v271_v1, %v202_v7  ;;  %v263_v23 = vpop.f32.mrf.mxu1 }
 0x143   :  { %v264_v27 = vadd.f32 %v263_v23, %v187_v26  ;;  %v283_v32 = vmax.f32 %v267_v24, 0.0 }
 0x144   :  { %v285_v25 = vmax.f32 %v272_v16, 0.0 }
 0x145   :  { %v282_v33 = vmax.f32 %v264_v27, 0.0 }
 0x147   :  { %v293_v36 = vpack.c.bf16 %v282_v33, %v281_v35 }
 0x148   :  { %v268_v15 = vpop.f32.mrf.mxu2 }
 0x149   :  { %v273_v2 = vpop.f32.mrf.mxu3  ;;  %v269_v20 = vadd.f32 %v268_v15, %v197_v19 }
 0x14a   :  { %v274_v13 = vadd.f32 %v273_v2, %v207_v11 }
 0x14b   :  { %v284_v28 = vmax.f32 %v269_v20, 0.0 }
 0x14c   :  { %v286_v21 = vmax.f32 %v274_v13, 0.0 }
 0x14d   :  { %v294_v34 = vpack.c.bf16 %v284_v28, %v283_v32 }
 0x14e   :  { %v295_v29 = vpack.c.bf16 %v286_v21, %v285_v25 }
 0x151   :  { %v276_v6 = vpop.f32.mrf.mxu3 }
 0x152   :  { %v277_v10 = vadd.f32 %v276_v6, %v212_v4 }
 0x154   :  { %v287_v17 = vmax.f32 %v277_v10, 0.0 }
 0x159   :  { %v278_v12 = vpop.f32.mrf.mxu3 }
 0x15a   :  { %v279_v14 = vadd.f32 %v278_v12, %v217_v3 }
 0x15c   :  { %v288_v18 = vmax.f32 %v279_v14, 0.0 }
 0x15e   :  { %v296_v22 = vpack.c.bf16 %v288_v18, %v287_v17 }
 0x160   :  { %319 = vmatpush.bf16.msrb.mxu2 %v296_v22 }
 0x164   :  { %320 = vmatpush.bf16.msrb.mxu2 %v295_v29 }
 0x168   :  { %321 = vmatpush.bf16.msrb.mxu2 %v294_v34 }
 0x16c   :  { %322 = vmatpush.bf16.msrb.mxu2 %v293_v36 }
 0x16f   :  { %392 = vmatmul.msk.bf16.vlgmr.msrb.gmra.mxu2 %vm239_vm2, %v401_v37 }
 0x1f2   :  { %v324_v38 = vpop.f32.mrf.mxu2 }
 0x1f3   :  { %v325_v42 = vadd.f32 %v324_v38, %v300_v40 }
 0x1fa   :  { %v326_v41 = vpop.f32.mrf.mxu2 }
 0x1fb   :  { %v327_v43 = vadd.f32 %v326_v41, %v305_v39 }
 0x1fd   :  { %v329_v44 = vmul.f32 %v327_v43, %v325_v42 }
 0x1ff   :  { %v330_v45 = vpack.c.bf16 %v329_v44, %v329_v44 }
 0x201   :  { %331 = vst [vmem:[#allocation2] sm:$0xf] %v330_v45 }
 0x202   :  { %342 = dma.vmem_to_hbm [thread:$0]  %s338_s28, 64, %s340_s30, [#allocation3]  }
 0x203   :  { %440 = dma.done.wait [#allocation3], 64  }
 0x204   :  { %441 = vsyncadd [#allocation3], 4294967232 }
 0x205   :  { %347 = vsyncpa [#allocation3], 1 }

</bundles_post_ra>
